<compile_context>
chip_gen: v7x
topology: tpu7x:2x2x1
jax: 0.10.0
libtpu: 0.0.40
codegen_flags: <defaults>
</compile_context>

<pallas_src>
import functools

import numpy as np
import jax
import jax.numpy as jnp
from jax.experimental import pallas as pl
from jax.experimental.pallas import tpu as pltpu


# ---------------- trace-time interpolation weight matrices (numpy) -----------

def _nearest_w(in_size, out_size):
    # PyTorch 'nearest': src = floor(dst * in/out), clamped.  Exact int formula.
    dst = np.arange(out_size)
    src = np.minimum((dst * in_size) // out_size, in_size - 1)
    w = np.zeros((out_size, in_size), np.float32)
    w[dst, src] = 1.0
    return w


def _linear_w_ac(in_size, out_size):
    # 'linear'/'bilinear', align_corners=True: src = dst * (in-1)/(out-1)
    if out_size == 1:
        src = np.zeros((1,), np.float64)
    else:
        src = np.arange(out_size, dtype=np.float64) * (in_size - 1) / (out_size - 1)
    i0 = np.clip(np.floor(src).astype(np.int64), 0, in_size - 1)
    i1 = np.minimum(i0 + 1, in_size - 1)
    frac = src - i0
    w = np.zeros((out_size, in_size), np.float64)
    rows = np.arange(out_size)
    np.add.at(w, (rows, i0), 1.0 - frac)
    np.add.at(w, (rows, i1), frac)
    return w.astype(np.float32)


def _cubic_w(in_size, out_size):
    # 'bicubic', align_corners=False, PyTorch cubic convolution, A = -0.75.
    # src is NOT clamped (PyTorch doesn't for cubic); tap indices are bounded.
    A = -0.75
    scale = in_size / out_size
    dst = np.arange(out_size, dtype=np.float64)
    src = (dst + 0.5) * scale - 0.5
    i_f = np.floor(src)
    t = src - i_f
    i_f = i_f.astype(np.int64)

    def c1(u):  # |u| <= 1
        return ((A + 2.0) * u - (A + 3.0)) * u * u + 1.0

    def c2(u):  # 1 < |u| < 2
        return ((A * u - 5.0 * A) * u + 8.0 * A) * u - 4.0 * A

    wts = np.stack([c2(t + 1.0), c1(t), c1(1.0 - t), c2(2.0 - t)], axis=1)   # (out, 4)
    idx = np.clip(np.stack([i_f - 1, i_f, i_f + 1, i_f + 2], axis=1), 0, in_size - 1)
    w = np.zeros((out_size, in_size), np.float64)
    rows = np.repeat(np.arange(out_size), 4)
    np.add.at(w, (rows, idx.reshape(-1)), wts.reshape(-1))
    return w.astype(np.float32)


@functools.lru_cache(maxsize=None)
def _build_weights(Wx, C, Hy, Wy, Hz, Wz):
    """Memoized trace-time weight construction for the five resizes."""
    s0 = Wx // 6                         # out0: x.size(2)//6          (nearest)
    s1 = C * 2                           # out1: y.size(1)*2           (linear, ac=True)
    Ho2, Wo2 = Wz + 2, Hz - 2            # out2: (z.size(3)+2, z.size(2)-2) (nearest)
    Ho3, Wo3 = C * 2, C * 4              # out3: (y.size(1)*2, y.size(1)*4) (bilinear, ac=True)
    Ho4, Wo4 = Wy, Hy                    # out4: (y.size(3), y.size(2))     (bicubic, ac=False)

    # x-resizes share the same input -> one concatenated weight, one dot.
    w01 = np.concatenate([_nearest_w(Wx, s0).T,
                          _linear_w_ac(Wx, s1).T], axis=1)                   # (Wx, s0+s1)
    # 2-D resizes: kron(Wh, Ww) so the kernel output is a flat (B, Ho*Wo) slab.
    w2 = np.kron(_nearest_w(Hy, Ho2), _nearest_w(Wy, Wo2)).T                 # (Hy*Wy, Ho2*Wo2)
    w34 = np.concatenate(
        [np.kron(_linear_w_ac(Hz, Ho3), _linear_w_ac(Wz, Wo3)).T,
         np.kron(_cubic_w(Hz, Ho4), _cubic_w(Wz, Wo4)).T], axis=1)           # (Hz*Wz, n3+n4)

    sizes = (s0, s1, Ho2, Wo2, Ho3, Wo3, Ho4, Wo4)
    return sizes, w01, w2, w34


# ---------------- fused kernel ------------------------------------------------

def _fused_resize_kernel(inp_ref, w01_ref, w2_ref, w34_ref, out_ref,
                         *, kx, ky, n2, n34):
    # Read the merged activation slab once, then slice at static offsets.
    inp = inp_ref[...]                               # (bm, kx+ky+kz)
    xa = inp[:, :kx]                                 # x  rows (B, Wx)
    ya = inp[:, kx:kx + ky]                          # y  rows (B, Hy*Wy)
    za = inp[:, kx + ky:]                            # z  rows (B, Hz*Wz)

    # Three MXU dots cover all five interpolations.
    r2 = jnp.dot(ya, w2_ref[...], preferred_element_type=jnp.float32)    # out2
    r34 = jnp.dot(za, w34_ref[...], preferred_element_type=jnp.float32)  # out3|out4
    r01 = jnp.dot(xa, w01_ref[...], preferred_element_type=jnp.float32)  # out0|out1

    # Pack into ONE lane-dense output slab: wide slabs first, tiny tail last,
    # so only the final few lanes take a masked store; single writeback DMA.
    out_ref[:, :n2] = r2.astype(out_ref.dtype)
    out_ref[:, n2:n2 + n34] = r34.astype(out_ref.dtype)
    out_ref[:, n2 + n34:] = r01.astype(out_ref.dtype)


# ---------------- model forward ------------------------------------------------

def model_forward(x, y, z):
    N, C, Wx = x.shape
    _, _, Hy, Wy = y.shape
    _, _, Hz, Wz = z.shape
    B = N * C

    sizes, w01_np, w2_np, w34_np = _build_weights(Wx, C, Hy, Wy, Hz, Wz)
    s0, s1, Ho2, Wo2, Ho3, Wo3, Ho4, Wo4 = sizes
    n0, n1 = s0, s1
    n2, n3, n4 = Ho2 * Wo2, Ho3 * Wo3, Ho4 * Wo4
    n34, n01 = n3 + n4, n0 + n1
    total = n2 + n34 + n01

    kx, ky, kz = Wx, Hy * Wy, Hz * Wz
    ktot = kx + ky + kz

    # Single activation operand (1 input DMA descriptor).  Reshapes are free;
    # the concat is one tiny (~11 KiB) copy in the wrapper.
    inp = jnp.concatenate(
        [x.reshape(B, kx), y.reshape(B, ky), z.reshape(B, kz)], axis=1)

    w01 = jnp.asarray(w01_np)
    w2 = jnp.asarray(w2_np)
    w34 = jnp.asarray(w34_np)

    kernel = functools.partial(_fused_resize_kernel, kx=kx, ky=ky, n2=n2, n34=n34)
    out_shape = jax.ShapeDtypeStruct((B, total), x.dtype)

    if B >= 256:
        # Scalability path for large N*C: parallel 1-D grid over the folded
        # batch; weights stay VMEM-resident (index_map always (0, 0)), so only
        # activations/outputs stream and get double-buffered.
        bm = 256
        out = pl.pallas_call(
            kernel,
            out_shape=out_shape,
            grid=(pl.cdiv(B, bm),),
            in_specs=[pl.BlockSpec((bm, ktot), lambda i: (i, 0)),
                      pl.BlockSpec(w01.shape, lambda i: (0, 0)),
                      pl.BlockSpec(w2.shape, lambda i: (0, 0)),
                      pl.BlockSpec(w34.shape, lambda i: (0, 0))],
            out_specs=pl.BlockSpec((bm, total), lambda i: (i, 0)),
            compiler_params=pltpu.CompilerParams(
                dimension_semantics=("parallel",)),
        )(inp, w01, w2, w34)
    else:
        # Small N*C (the test case): single-shot, no grid, default VMEM limits
        # (total footprint < 1 MiB), nothing sharded across TensorCores.
        out = pl.pallas_call(kernel, out_shape=out_shape)(inp, w01, w2, w34)

    # Slice the merged slab back to the five PyTorch outputs.
    o2 = out[:, :n2].reshape(N, C, Ho2, Wo2)
    o3 = out[:, n2:n2 + n3].reshape(N, C, Ho3, Wo3)
    o4 = out[:, n2 + n3:n2 + n34].reshape(N, C, Ho4, Wo4)
    o0 = out[:, n2 + n34:n2 + n34 + n0].reshape(N, C, s0)
    o1 = out[:, n2 + n34 + n0:].reshape(N, C, s1)
    return (o0, o1, o2, o3, o4)


# ---------------- self-test ----------------------------------------------------

if __name__ == "__main__":
    key = jax.random.PRNGKey(0)
    k1, k2, k3 = jax.random.split(key, 3)
    # small shapes consistent with the forward's size expressions
    x = jax.random.uniform(k1, (2, 4, 24), dtype=jnp.float32)      # NCW
    y = jax.random.uniform(k2, (2, 4, 12, 16), dtype=jnp.float32)  # NCHW
    z = jax.random.uniform(k3, (2, 4, 10, 14), dtype=jnp.float32)  # NCHW

    fwd = jax.jit(model_forward)
    outs = jax.block_until_ready(fwd(x, y, z))

    # expected output shapes
    assert outs[0].shape == (2, 4, 4)        # x.size(2)//6 = 4
    assert outs[1].shape == (2, 4, 8)        # y.size(1)*2 = 8
    assert outs[2].shape == (2, 4, 16, 8)    # (z.size(3)+2, z.size(2)-2)
    assert outs[3].shape == (2, 4, 8, 16)    # (y.size(1)*2, y.size(1)*4)
    assert outs[4].shape == (2, 4, 16, 12)   # (y.size(3), y.size(2))

    # numpy reference: per-axis application (no kron, no Pallas) of the same
    # PyTorch interpolation semantics for all five outputs.
    xn, yn, zn = np.asarray(x), np.asarray(y), np.asarray(z)

    def res1d(a, w):                       # (N,C,W) x (out,W) -> (N,C,out)
        return np.tensordot(a, w, axes=([-1], [1]))

    def res2d(a, wh, ww):                  # (N,C,H,W) -> (N,C,Ho,Wo)
        t = np.tensordot(a, wh, axes=([2], [1]))   # (N,C,W,Ho)
        return np.tensordot(t, ww, axes=([2], [1]))

    ref0 = res1d(xn, _nearest_w(24, 4))
    ref1 = res1d(xn, _linear_w_ac(24, 8))
    ref2 = res2d(yn, _nearest_w(12, 16), _nearest_w(16, 8))
    ref3 = res2d(zn, _linear_w_ac(10, 8), _linear_w_ac(14, 16))
    ref4 = res2d(zn, _cubic_w(10, 16), _cubic_w(14, 12))
    for o, r in zip(outs, (ref0, ref1, ref2, ref3, ref4)):
        np.testing.assert_allclose(np.asarray(o), r, rtol=0, atol=2e-2)

    # fully independent integer-gather check of the two nearest paths
    src0 = (np.arange(4) * 24) // 4
    np.testing.assert_allclose(np.asarray(outs[0]), xn[:, :, src0], atol=1e-2)
    hsrc = (np.arange(16) * 12) // 16
    wsrc = (np.arange(8) * 16) // 8
    np.testing.assert_allclose(np.asarray(outs[2]), yn[:, :, hsrc][:, :, :, wsrc], atol=1e-2)

    assert all(bool(jnp.all(jnp.isfinite(o))) for o in outs)

    print("KERNEL_OK")
</pallas_src>

<mosaic_0001>
module attributes {stable_mosaic.version = 11 : i64} {
  func.func @_fused_resize_kernel(%arg0: memref<8x356xf32, #tpu.memory_space<vmem>>, %arg1: memref<24x12xf32, #tpu.memory_space<vmem>>, %arg2: memref<192x128xf32, #tpu.memory_space<vmem>>, %arg3: memref<140x320xf32, #tpu.memory_space<vmem>>, %arg4: memref<8x460xf32, #tpu.memory_space<vmem>>) attributes {dimension_semantics = [], scalar_prefetch = 0 : i64, scratch_operands = 0 : i64, tpu.core_type = #tpu.core_type<tc>} {
    %c0 = arith.constant 0 : index
    %c0_0 = arith.constant 0 : index
    %0 = vector.load %arg0[%c0, %c0_0] : memref<8x356xf32, #tpu.memory_space<vmem>>, vector<8x356xf32>
    %1 = vector.extract_strided_slice %0 {offsets = [0, 0], sizes = [8, 24], strides = [1, 1]} : vector<8x356xf32> to vector<8x24xf32>
    %2 = vector.extract_strided_slice %0 {offsets = [0, 24], sizes = [8, 192], strides = [1, 1]} : vector<8x356xf32> to vector<8x192xf32>
    %3 = vector.extract_strided_slice %0 {offsets = [0, 216], sizes = [8, 140], strides = [1, 1]} : vector<8x356xf32> to vector<8x140xf32>
    %c0_1 = arith.constant 0 : index
    %c0_2 = arith.constant 0 : index
    %4 = vector.load %arg2[%c0_1, %c0_2] : memref<192x128xf32, #tpu.memory_space<vmem>>, vector<192x128xf32>
    %cst = arith.constant dense<0.000000e+00> : vector<8x128xf32>
    %5 = tpu.matmul %2, %4, %cst {dimension_numbers = #tpu.dot_dimension_numbers<[1], [0], [0], [1], [0, 0, 1, 1], [], []>} : vector<8x192xf32>, vector<192x128xf32>, vector<8x128xf32> -> vector<8x128xf32>
    %c0_3 = arith.constant 0 : index
    %c0_4 = arith.constant 0 : index
    %6 = vector.load %arg3[%c0_3, %c0_4] : memref<140x320xf32, #tpu.memory_space<vmem>>, vector<140x320xf32>
    %cst_5 = arith.constant dense<0.000000e+00> : vector<8x320xf32>
    %7 = tpu.matmul %3, %6, %cst_5 {dimension_numbers = #tpu.dot_dimension_numbers<[1], [0], [0], [1], [0, 0, 1, 1], [], []>} : vector<8x140xf32>, vector<140x320xf32>, vector<8x320xf32> -> vector<8x320xf32>
    %c0_6 = arith.constant 0 : index
    %c0_7 = arith.constant 0 : index
    %8 = vector.load %arg1[%c0_6, %c0_7] : memref<24x12xf32, #tpu.memory_space<vmem>>, vector<24x12xf32>
    %cst_8 = arith.constant dense<0.000000e+00> : vector<8x12xf32>
    %9 = tpu.matmul %1, %8, %cst_8 {dimension_numbers = #tpu.dot_dimension_numbers<[1], [0], [0], [1], [0, 0, 1, 1], [], []>} : vector<8x24xf32>, vector<24x12xf32>, vector<8x12xf32> -> vector<8x12xf32>
    %c0_9 = arith.constant 0 : index
    %c0_10 = arith.constant 0 : index
    %10 = vector.load %arg4[%c0_9, %c0_10] : memref<8x460xf32, #tpu.memory_space<vmem>>, vector<8x128xf32>
    tpu.vector_store %arg4[%c0_9, %c0_10], %5 {strides = array<i32>} : memref<8x460xf32, #tpu.memory_space<vmem>>, vector<8x128xf32>,
    %c0_11 = arith.constant 0 : index
    %c128 = arith.constant 128 : index
    %11 = vector.load %arg4[%c0_11, %c128] : memref<8x460xf32, #tpu.memory_space<vmem>>, vector<8x320xf32>
    tpu.vector_store %arg4[%c0_11, %c128], %7 {strides = array<i32>} : memref<8x460xf32, #tpu.memory_space<vmem>>, vector<8x320xf32>,
    %c0_12 = arith.constant 0 : index
    %c448 = arith.constant 448 : index
    %12 = vector.load %arg4[%c0_12, %c448] : memref<8x460xf32, #tpu.memory_space<vmem>>, vector<8x12xf32>
    tpu.vector_store %arg4[%c0_12, %c448], %9 {strides = array<i32>} : memref<8x460xf32, #tpu.memory_space<vmem>>, vector<8x12xf32>,
    return
  }
}

</mosaic_0001>

<bundles_post_ra>
// kernel: model_forward.1
= control target key start
LH: loop header
LB: loop body
LE: loop exit
PB: predicated region body
PF: predicated region fallthrough
CT: control target
= control target key end

     0   :  { %v564_v2 = vmov 0.0|0.0   ;;  %s565_s19 = smov 104   ;;  %s566_s20 = smov 40   ;;  %vm191_vm0 = vcmask 1043456   ;;  %vm567_vm1 = vmmov 1   ;;  %vm53_vm3 = vcmask 523264   ;;  %s903_s0 = inlined_call_operand.vmem [shape: f32[8,356], index: 0, kind: input, shape index: {}]   ;;  %s904_s2 = inlined_call_operand.vmem [shape: f32[192,128], index: 2, kind: input, shape index: {}]   ;;  %s905_s3 = inlined_call_operand.vmem [shape: f32[140,320], index: 3, kind: input, shape index: {}]   ;;  %s906_s1 = inlined_call_operand.vmem [shape: f32[24,12], index: 1, kind: input, shape index: {}]   ;;  %s907_s4 = inlined_call_operand.vmem [shape: f32[8,460], index: 4, kind: output, shape index: {}]  }
   0x1   :  { %v599_v0 = vld [vmem:[%s903_s0] sm:$0xff]  ;;  %v18_v1 = vld [vmem:[%s903_s0 + $0x8] sm:$0xff]  ;;  %452 = vmatprep.subr.bf16.mxu0 %v564_v2  ;;  %v19_v5 = vld [vmem:[%s903_s0 + $0x10] sm:$0xff]  ;;  %vm50_vm4 = vcmask 850944   ;;  %vm188_vm5 = vcmask 97280   ;;  %vm185_vm6 = vcmask 326656  }
   0x2   :  { %46 = vrot.lane.b32.xlu0 %v599_v0, %s565_s19  ;;  %181 = vrot.lane.b32.xlu1 %v18_v1, %s566_s20  ;;  %v20_v3 = vld [vmem:[%s904_s2] sm:$0xff]  ;;  %v21_v4 = vld [vmem:[%s904_s2 + $0x8] sm:$0xff]  ;;  %vm799_vm2 = vmpackc.low %vm191_vm0, %vm567_vm1  ;;  %vm568_vm7 = vmmov 0   ;;  %vm345_vm8 = vcmask 195584   ;;  %vm426_vm9 = vcmask 622080  }
   0x3   :  { %v453_v6 = vpack.c.bf16 %v21_v4, %v20_v3  ;;  %v22_v7 = vld [vmem:[%s904_s2 + $0x10] sm:$0xff]  ;;  %v23_v8 = vld [vmem:[%s904_s2 + $0x18] sm:$0xff]  ;;  %v24_v10 = vld [vmem:[%s904_s2 + $0x20] sm:$0xff] }
   0x4   :  { %v456_v9 = vpack.c.bf16 %v23_v8, %v22_v7  ;;  %v25_v11 = vld [vmem:[%s904_s2 + $0x28] sm:$0xff]  ;;  %v26_v13 = vld [vmem:[%s904_s2 + $0x30] sm:$0xff]  ;;  %v27_v14 = vld [vmem:[%s904_s2 + $0x38] sm:$0xff] }
   0x5   :  { %454 = vmatpush1.bf16.msra.mxu0 %v453_v6  ;;  %v459_v12 = vpack.c.bf16 %v25_v11, %v24_v10  ;;  %v127_v15 = vld [vmem:[%s905_s3 + $0x8] sm:$0xff]  ;;  %v28_v16 = vld [vmem:[%s904_s2 + $0x40] sm:$0xff]  ;;  %v129_v20 = vld [vmem:[%s905_s3 + $0x18] sm:$0xff]  ;;  %v462_v21 = vpack.c.bf16 %v27_v14, %v26_v13 }
   0x6   :  { %48 = vrot.lane.b32.xlu0 %v18_v1, %s565_s19  ;;  %183 = vrot.lane.b32.xlu1 %v19_v5, %s566_s20  ;;  %v29_v17 = vld [vmem:[%s904_s2 + $0x48] sm:$0xff]  ;;  %v130_v18 = vld [vmem:[%s905_s3 + $0x20] sm:$0xff] }
   0x7   :  { %455 = vmatprep.subr.bf16.mxu0 %v564_v2  ;;  %v126_v19 = vld [vmem:[%s905_s3] sm:$0xff]  ;;  %v488_v22 = vpack.c.bf16 %v130_v18, %v127_v15  ;;  %v133_v24 = vld [vmem:[%s905_s3 + $0x38] sm:$0xff]  ;;  %v136_v25 = vld [vmem:[%s905_s3 + $0x50] sm:$0xff]  ;;  %v465_v32 = vpack.c.bf16 %v29_v17, %v28_v16 }
   0x8   :  { %v490_v23 = vpack.c.bf16 %v129_v20, %v126_v19  ;;  %v132_v26 = vld [vmem:[%s905_s3 + $0x30] sm:$0xff]  ;;  %v492_v27 = vpack.c.bf16 %v136_v25, %v133_v24  ;;  %v135_v28 = vld [vmem:[%s905_s3 + $0x48] sm:$0xff]  ;;  %v142_v30 = vld [vmem:[%s905_s3 + $0x80] sm:$0xff] }
   0x9   :  { %457 = vmatpush1.bf16.msra.mxu0 %v456_v9  ;;  %v139_v29 = vld [vmem:[%s905_s3 + $0x68] sm:$0xff]  ;;  %489 = vmatprep.subr.bf16.mxu1 %v488_v22  ;;  %v494_v31 = vpack.c.bf16 %v135_v28, %v132_v26  ;;  %v30_v33 = vld [vmem:[%s904_s2 + $0x50] sm:$0xff]  ;;  %v138_v35 = vld [vmem:[%s905_s3 + $0x60] sm:$0xff] }
   0xa   :  { %458 = vmatprep.subr.bf16.mxu0 %v564_v2  ;;  %491 = vmatpush1.bf16.msra.mxu1 %v490_v23  ;;  %v496_v34 = vpack.c.bf16 %v142_v30, %v139_v29  ;;  %v141_v36 = vld [vmem:[%s905_s3 + $0x78] sm:$0xff]  ;;  %v148_v39 = vld [vmem:[%s905_s3 + $0xb0] sm:$0xff]  ;;  %v32_v42 = vld [vmem:[%s904_s2 + $0x60] sm:$0xff] }
   0xb   :  { %493 = vmatprep.subr.bf16.mxu1 %v492_v27  ;;  %v31_v37 = vld [vmem:[%s904_s2 + $0x58] sm:$0xff]  ;;  %v498_v40 = vpack.c.bf16 %v141_v36, %v138_v35  ;;  %v144_v44 = vld [vmem:[%s905_s3 + $0x90] sm:$0xff]  ;;  %v147_v45 = vld [vmem:[%s905_s3 + $0xa8] sm:$0xff] }
   0xc   :  { %v145_v38 = vld [vmem:[%s905_s3 + $0x98] sm:$0xff]  ;;  %v468_v41 = vpack.c.bf16 %v31_v37, %v30_v33  ;;  %v33_v46 = vld [vmem:[%s904_s2 + $0x68] sm:$0xff]  ;;  %v154_v48 = vld [vmem:[%s905_s3 + $0xe0] sm:$0xff]  ;;  %v502_v49 = vpack.c.bf16 %v147_v45, %v144_v44 }
   0xd   :  { %460 = vmatpush1.bf16.msra.mxu0 %v459_v12  ;;  %v500_v43 = vpack.c.bf16 %v148_v39, %v145_v38  ;;  %v151_v47 = vld [vmem:[%s905_s3 + $0xc8] sm:$0xff]  ;;  %v471_v50 = vpack.c.bf16 %v33_v46, %v32_v42  ;;  %v34_v51 = vld [vmem:[%s904_s2 + $0x70] sm:$0xff]  ;;  %v150_v53 = vld [vmem:[%s905_s3 + $0xc0] sm:$0xff] }
   0xe   :  { %461 = vmatprep.subr.bf16.mxu0 %v564_v2  ;;  %495 = vmatpush1.bf16.msra.mxu1 %v494_v31  ;;  %v504_v52 = vpack.c.bf16 %v154_v48, %v151_v47  ;;  %v153_v54 = vld [vmem:[%s905_s3 + $0xd8] sm:$0xff]  ;;  %v160_v57 = vld [vmem:[%s905_s3 + $0x110] sm:$0xff]  ;;  %v36_v60 = vld [vmem:[%s904_s2 + $0x80] sm:$0xff]  ;;  %v569_v47 = vmov 0.0  }
   0xf   :  { %497 = vmatprep.subr.bf16.mxu1 %v496_v34  ;;  %v35_v55 = vld [vmem:[%s904_s2 + $0x78] sm:$0xff]  ;;  %v506_v58 = vpack.c.bf16 %v153_v54, %v150_v53  ;;  %v156_v62 = vld [vmem:[%s905_s3 + $0xf0] sm:$0xff]  ;;  %v159_v63 = vld [vmem:[%s905_s3 + $0x108] sm:$0xff] }
  0x10   :  { %v157_v56 = vld [vmem:[%s905_s3 + $0xf8] sm:$0xff]  ;;  %v474_v59 = vpack.c.bf16 %v35_v55, %v34_v51  ;;  %v37_v1 = vld [vmem:[%s904_s2 + $0x88] sm:$0xff]  ;;  %v166_v4 = vld [vmem:[%s905_s3 + $0x140] sm:$0xff]  ;;  %v510_v5 = vpack.c.bf16 %v159_v63, %v156_v62 }
  0x11   :  { %463 = vmatpush1.bf16.msra.mxu0 %v462_v21  ;;  %v508_v61 = vpack.c.bf16 %v160_v57, %v157_v56  ;;  %v163_v3 = vld [vmem:[%s905_s3 + $0x128] sm:$0xff]  ;;  %v477_v6 = vpack.c.bf16 %v37_v1, %v36_v60  ;;  %v38_v7 = vld [vmem:[%s904_s2 + $0x90] sm:$0xff]  ;;  %v162_v9 = vld [vmem:[%s905_s3 + $0x120] sm:$0xff] }
  0x12   :  { %464 = vmatprep.subr.bf16.mxu0 %v564_v2  ;;  %499 = vmatpush1.bf16.msra.mxu1 %v498_v40  ;;  %v512_v8 = vpack.c.bf16 %v166_v4, %v163_v3  ;;  %v165_v10 = vld [vmem:[%s905_s3 + $0x138] sm:$0xff]  ;;  %v172_v13 = vld [vmem:[%s905_s3 + $0x170] sm:$0xff]  ;;  %v40_v16 = vld [vmem:[%s904_s2 + $0xa0] sm:$0xff] }
  0x13   :  { %501 = vmatprep.subr.bf16.mxu1 %v500_v43  ;;  %v39_v11 = vld [vmem:[%s904_s2 + $0x98] sm:$0xff]  ;;  %v514_v14 = vpack.c.bf16 %v165_v10, %v162_v9  ;;  %v168_v18 = vld [vmem:[%s905_s3 + $0x150] sm:$0xff]  ;;  %v171_v19 = vld [vmem:[%s905_s3 + $0x168] sm:$0xff] }
  0x14   :  { %v169_v12 = vld [vmem:[%s905_s3 + $0x158] sm:$0xff]  ;;  %v480_v15 = vpack.c.bf16 %v39_v11, %v38_v7  ;;  %v41_v20 = vld [vmem:[%s904_s2 + $0xa8] sm:$0xff]  ;;  %v178_v22 = vld [vmem:[%s905_s3 + $0x1a0] sm:$0xf]  ;;  %v518_v23 = vpack.c.bf16 %v171_v19, %v168_v18 }
  0x15   :  { %466 = vmatpush1.bf16.msra.mxu0 %v465_v32  ;;  %v516_v17 = vpack.c.bf16 %v172_v13, %v169_v12  ;;  %v175_v21 = vld [vmem:[%s905_s3 + $0x188] sm:$0xff]  ;;  %v483_v24 = vpack.c.bf16 %v41_v20, %v40_v16  ;;  %v174_v26 = vld [vmem:[%s905_s3 + $0x180] sm:$0xff]  ;;  %v177_v27 = vld [vmem:[%s905_s3 + $0x198] sm:$0xf] }
  0x16   :  { %467 = vmatprep.subr.bf16.mxu0 %v564_v2  ;;  %503 = vmatpush1.bf16.msra.mxu1 %v502_v49  ;;  %v520_v25 = vpack.c.bf16 %v178_v22, %v175_v21  ;;  %v42_v28 = vld [vmem:[%s904_s2 + $0xb0] sm:$0xff]  ;;  %v43_v29 = vld [vmem:[%s904_s2 + $0xb8] sm:$0xff]  ;;  %v523_v31 = vpack.c.bf16 %v177_v27, %v174_v26  ;;  %v342_v34 = vld [vmem:[%s906_s1] sm:$0xff] }
  0x17   :  { %505 = vmatprep.subr.bf16.mxu1 %v504_v52  ;;  %v486_v32 = vpack.c.bf16 %v43_v29, %v42_v28  ;;  %v343_v35 = vld [vmem:[%s906_s1 + $0x8] sm:$0xff]  ;;  %v128_v37 = vld [vmem:[%s905_s3 + $0x10] sm:$0xff]  ;;  %v134_v45 = vld [vmem:[%s905_s3 + $0x40] sm:$0xff] }
  0x18   :  { %v131_v38 = vld [vmem:[%s905_s3 + $0x28] sm:$0xff]  ;;  %v555_v39 = vpack.c.bf16 %v343_v35, %v342_v34  ;;  %v137_v46 = vld [vmem:[%s905_s3 + $0x58] sm:$0xff]  ;;  %v344_v48 = vld [vmem:[%s906_s1 + $0x10] sm:$0xff]  ;;  %s570_s1 = smov 64  }
  0x19   :  { %469 = vmatpush1.bf16.msra.mxu0 %v468_v41  ;;  %v527_v42 = vpack.c.bf16 %v131_v38, %v128_v37  ;;  %v530_v49 = vpack.c.bf16 %v137_v46, %v134_v45  ;;  %v143_v51 = vld [vmem:[%s905_s3 + $0x88] sm:$0xff]  ;;  %v146_v53 = vld [vmem:[%s905_s3 + $0xa0] sm:$0xff]  ;;  %v149_v54 = vld [vmem:[%s905_s3 + $0xb8] sm:$0xff] }
  0x1a   :  { %470 = vmatprep.subr.bf16.mxu0 %v564_v2  ;;  %507 = vmatpush1.bf16.msra.mxu1 %v506_v58  ;;  %v536_v55 = vpack.c.bf16 %v149_v54, %v146_v53  ;;  %v155_v56 = vld [vmem:[%s905_s3 + $0xe8] sm:$0xff]  ;;  %v158_v58 = vld [vmem:[%s905_s3 + $0x100] sm:$0xff]  ;;  %v173_v3 = vld [vmem:[%s905_s3 + $0x178] sm:$0xff] }
  0x1b   :  { %509 = vmatprep.subr.bf16.mxu1 %v508_v61  ;;  %v164_v61 = vld [vmem:[%s905_s3 + $0x130] sm:$0xff]  ;;  %v167_v62 = vld [vmem:[%s905_s3 + $0x148] sm:$0xff]  ;;  %v170_v1 = vld [vmem:[%s905_s3 + $0x160] sm:$0xff] }
  0x1c   :  { %v545_v63 = vpack.c.bf16 %v167_v62, %v164_v61  ;;  %v548_v4 = vpack.c.bf16 %v173_v3, %v170_v1 }
  0x1d   :  { %472 = vmatpush1.bf16.msra.mxu0 %v471_v50  ;;  %v140_v50 = vld [vmem:[%s905_s3 + $0x70] sm:$0xff] }
  0x1e   :  { %473 = vmatprep.subr.bf16.mxu0 %v564_v2  ;;  %511 = vmatpush1.bf16.msra.mxu1 %v510_v5  ;;  %v533_v52 = vpack.c.bf16 %v143_v51, %v140_v50  ;;  %v176_v5 = vld [vmem:[%s905_s3 + $0x190] sm:$0xff] }
  0x1f   :  { %513 = vmatprep.subr.bf16.mxu1 %v512_v8 }
  0x21   :  { %475 = vmatpush1.bf16.msra.mxu0 %v474_v59  ;;  %v161_v59 = vld [vmem:[%s905_s3 + $0x118] sm:$0xff] }
  0x22   :  { %476 = vmatprep.subr.bf16.mxu0 %v564_v2  ;;  %515 = vmatpush1.bf16.msra.mxu1 %v514_v14  ;;  %v542_v60 = vpack.c.bf16 %v161_v59, %v158_v58 }
  0x23   :  { %517 = vmatprep.subr.bf16.mxu1 %v516_v17 }
  0x25   :  { %478 = vmatpush1.bf16.msra.mxu0 %v477_v6  ;;  %v179_v6 = vld [vmem:[%s905_s3 + $0x1a8] sm:$0xf] }
  0x26   :  { %479 = vmatprep.subr.bf16.mxu0 %v564_v2  ;;  %519 = vmatpush1.bf16.msra.mxu1 %v518_v23  ;;  %v551_v7 = vpack.c.bf16 %v179_v6, %v176_v5 }
  0x27   :  { %522 = vmatprep.subr.msk.bf16.mxu1 %vm799_vm2, %v520_v25 }
  0x29   :  { %481 = vmatpush1.bf16.msra.mxu0 %v480_v15 }
  0x2a   :  { %482 = vmatprep.subr.bf16.mxu0 %v564_v2  ;;  %525 = vmatpush1.bf16.msk.msra.mxu1 %vm799_vm2, %v523_v31 }
  0x2b   :  { %526 = vmatprep.subr.bf16.mxu1 %v564_v2 }
  0x2d   :  { %484 = vmatpush1.bf16.msra.mxu0 %v483_v24 }
  0x2e   :  { %485 = vmatprep.subr.bf16.mxu0 %v564_v2 }
  0x31   :  { %487 = vmatpush1.bf16.msra.mxu0 %v486_v32 }
  0x32   :  { %554 = vmatprep.subr.bf16.mxu0 %v564_v2 }
  0x74   :  { %v47_v33 = vpop.permute.xlu0 %46  ;;  %v182_v36 = vpop.permute.xlu1 %181 }
  0x78   :  { %v49_v40 = vpop.permute.xlu0 %48  ;;  %v184_v41 = vpop.permute.xlu1 %183 }
  0x79   :  { %432 = vmatprep.mubr.msk.f32.mxu0 %vm53_vm3, %v49_v40  ;;  %v51_v43 = vsel %vm50_vm4, %v47_v33, %v49_v40  ;;  %435 = vmatprep.mubr.msk.f32.mxu1 %vm188_vm5, %v184_v41  ;;  %v186_v44 = vsel %vm185_vm6, %v182_v36, %v184_v41 }
  0x7a   :  { %121 = vmatmul.mubr.f32.vlgmr.msra.gmra.mrb[0].mxu0 %v51_v43  ;;  %266 = vmatmul.mubr.f32.vlgmr.msra.gmra.mrb[0].mxu1 %v186_v44 }
  0x7b   :  { %556 = vmatpush3.bf16.msra.mxu0 %v555_v39  ;;  %449 = vmatprep.mubr.msk.f32.mxu0 %vm568_vm7, %v569_v47 }
  0x7c   :  { %447 = vmatprep.subr.mxu0 %v569_v47  ;;  %528 = vmatpush1.bf16.msra.mxu1 %v527_v42 }
  0x7d   :  { %529 = vmatprep.subr.bf16.mxu1 %v564_v2  ;;  %437 = vmatprep.mubr.msk.f32.mxu1 %vm188_vm5, %v184_v41 }
  0x7f   :  { %448 = vmatpush3.msra.mxu0 %v344_v48 }
  0x80   :  { %450 = vmatmul.mubr.msk.f32.vlgmr.msra.gmra.mrb[2].mxu0 %vm345_vm8, %v599_v0  ;;  %531 = vmatpush1.bf16.msra.mxu1 %v530_v49  ;;  %v152_v0 = vld [vmem:[%s905_s3 + $0xd0] sm:$0xff] }
  0x81   :  { %532 = vmatprep.subr.bf16.mxu1 %v564_v2  ;;  %v539_v57 = vpack.c.bf16 %v155_v56, %v152_v0 }
  0x84   :  { %534 = vmatpush1.bf16.msra.mxu1 %v533_v52 }
  0x85   :  { %535 = vmatprep.subr.bf16.mxu1 %v564_v2 }
  0x88   :  { %537 = vmatpush1.bf16.msra.mxu1 %v536_v55 }
  0x89   :  { %538 = vmatprep.subr.bf16.mxu1 %v564_v2 }
  0x8c   :  { %540 = vmatpush1.bf16.msra.mxu1 %v539_v57 }
  0x8d   :  { %541 = vmatprep.subr.bf16.mxu1 %v564_v2 }
  0x90   :  { %543 = vmatpush1.bf16.msra.mxu1 %v542_v60 }
  0x91   :  { %544 = vmatprep.subr.bf16.mxu1 %v564_v2 }
  0x94   :  { %546 = vmatpush1.bf16.msra.mxu1 %v545_v63 }
  0x95   :  { %547 = vmatprep.subr.bf16.mxu1 %v564_v2 }
  0x98   :  { %549 = vmatpush1.bf16.msra.mxu1 %v548_v4 }
  0x99   :  { %550 = vmatprep.subr.bf16.mxu1 %v564_v2 }
  0x9c   :  { %553 = vmatpush1.bf16.msk.msra.mxu1 %vm799_vm2, %v551_v7 }
  0x9f   :  { %337 = vmatmul.mubr.f32.vlgmr.msra.gmra.mrb[2].mxu1 %v186_v44 }
 0x14d   :  { %v122_v8 = vpop.f32.mrb[0].mxu0  ;;  %v267_v9 = vpop.f32.mrb[0].mxu1 }
 0x14e   :  { %418 = vst [vmem:[%s907_s4] sm:$0xff] %v122_v8  ;;  %v124_v10 = vpop.f32.mrb[1].mxu0  ;;  %419 = vst [vmem:[%s907_s4 + $0x8] sm:$0xff] %v267_v9  ;;  %v269_v11 = vpop.f32.mrb[1].mxu1 }
 0x14f   :  { %420 = vst [vmem:[%s907_s4 + $0x10] sm:$0xff] %v269_v11 }
 0x153   :  { %v414_v2 = vpop.f32.mrb[2].mxu0 }
 0x154   :  { %v451_v12 = vpop.f32.mrb[3].mxu0  ;;  %423 = vrot.lane.b32.xlu0 %v414_v2, %s570_s1 }
 0x172   :  { %v338_v13 = vpop.f32.mrb[2].mxu1 }
 0x173   :  { %421 = vst.msk [vmem:[%s907_s4 + $0x18] sm:$0xff] %vm53_vm3, %v338_v13  ;;  %v340_v14 = vpop.f32.mrb[3].mxu1 }
 0x1c6   :  { %v424_v15 = vpop.permute.xlu0 %423 }
 0x1c7   :  { %427 = vst.msk [vmem:[%s907_s4 + $0x18] sm:$0xff] %vm426_vm9, %v424_v15 }

</bundles_post_ra>
